<compile_context>
chip_gen: v6e
topology: v6e:2x2x1
jax: 0.10.0
libtpu: 0.0.40
codegen_flags: <defaults>
</compile_context>

<pallas_src>
import jax
import jax.numpy as jnp
from jax.experimental import pallas as pl
from jax.experimental.pallas import tpu as pltpu


_TILE_VMEM_BUDGET = 20 * 1024 * 1024   # conservative tile budget: fits every generation
_VMEM_LIMIT_BYTES = 32 * 1024 * 1024   # explicit scoped-VMEM limit (> v5e's 16 MiB default)


def _make_kernel(cp, g_is_eye):
    """Fused conv_h(+BN folded)+ReLU+conv_g+residual-add for one tile of output pixels."""

    def kernel(w_ref, b_ref, p_ref, o_ref):
        # One MXU matmul per pixel tile: (Cp+G, K) @ (K, tm), f32 accumulation.
        hg = jnp.dot(w_ref[...], p_ref[...],
                     preferred_element_type=jnp.float32) + b_ref[...]
        h = jnp.maximum(hg[:cp, :], 0.0)          # relu(BN(conv_h)); BN already in weights
        if g_is_eye:
            g = hg[cp:cp + 1, :]                  # frozen eye conv_g: same for every channel
        else:
            g = hg[cp:2 * cp, :]                  # general per-channel conv_g
        o_ref[...] = (h + g).astype(o_ref.dtype)  # f32 epilogue, cast on store

    return kernel


def _im2col_t(x_nchw, kh, kw, stride, pad, dilation):
    """(B,C,H,W) -> patches (K, M) with K ordered (cin,kh,kw), M ordered (b,oh,ow)."""
    B, C, H, W = x_nchw.shape
    xp = jnp.pad(x_nchw, ((0, 0), (0, 0), (pad, pad), (pad, pad)))
    OH = (H + 2 * pad - dilation * (kh - 1) - 1) // stride + 1
    OW = (W + 2 * pad - dilation * (kw - 1) - 1) // stride + 1
    cols = []
    for i in range(kh):
        for j in range(kw):
            hi, wj = i * dilation, j * dilation
            cols.append(xp[:, :, hi:hi + (OH - 1) * stride + 1:stride,
                               wj:wj + (OW - 1) * stride + 1:stride])
    pat = jnp.stack(cols, axis=2)                              # (B, C, KH*KW, OH, OW)
    pat = pat.reshape(B, C * kh * kw, OH * OW)                 # (B, K, OH*OW)
    pat = pat.transpose(1, 0, 2).reshape(C * kh * kw, B * OH * OW)  # (K, M)
    return pat, OH, OW


def _pick_tm(M, K, w_rows, out_rows, tm_req, in_itemsize):
    """Pixel-tile size: lane-dense (multiple of 128), >=2 grid steps, fits VMEM budget."""
    tm = max(128, (min(tm_req, max(M, 128)) // 128) * 128)
    if M > 128:
        # Keep at least 2 grid steps so both v7x TensorCores get work on the parallel axis.
        tm = min(tm, max(128, pl.cdiv(pl.cdiv(M, 2), 128) * 128))

    def fits(t):
        nbytes = (2 * t * K * in_itemsize        # patch tile, double-buffered
                  + 2 * t * out_rows * 4         # f32 output tile, double-buffered
                  + 2 * w_rows * K * in_itemsize # grid-invariant weight slab
                  + 2 * w_rows * 4)              # bias
        return nbytes <= _TILE_VMEM_BUDGET

    while tm > 128 and not fits(tm):
        tm -= 128
    return tm


def resconv2d_forward(x_nchw, params, *, bn_eps=1e-5, tm=1024,
                      g_is_eye=True, compute_dtype=jnp.bfloat16):
    wh, bh = params["wh"], params["bh"]
    wg, bg = params["wg"], params["bg"]
    gamma, beta = params["gamma"], params["beta"]
    rmean, rvar = params["running_mean"], params["running_var"]
    stride, pad, dilation = params["stride"], params["pad"], params["dilation"]

    Cout, Cin, KH, KW = wh.shape
    B = x_nchw.shape[0]
    K = Cin * KH * KW
    Cp = pl.cdiv(Cout, 8) * 8            # output channels live on sublanes: pad to 8, not 128

    # ---- Fold BatchNorm2d (eval) exactly into conv_h:  BN(conv(x;W,b)) = conv(x; W*sc, b*sc+sh)
    sc = gamma / jnp.sqrt(rvar + bn_eps)
    sh = beta - rmean * sc
    wh_f = (wh * sc[:, None, None, None]).reshape(Cout, K)
    bh_f = bh * sc + sh

    # ---- Stacked weight (Cp + G, K): folded conv_h rows first, then the residual-g rows.
    wh_rows = jnp.pad(wh_f, ((0, Cp - Cout), (0, 0)))
    bh_rows = jnp.pad(bh_f, (0, Cp - Cout))
    if g_is_eye:
        # conv_g is frozen at nn.init.eye_ with zero (channel-uniform) bias, so its output
        # does not depend on the output channel: one indicator row over the diagonal taps
        # of every input channel reproduces it exactly.
        G = 8                                            # pad to a full sublane tile
        eye2d = jnp.eye(KH, KW, dtype=jnp.float32)       # matches nn.init.eye_
        g_row = jnp.broadcast_to(eye2d, (Cin, KH, KW)).reshape(1, K)
        wg_rows = jnp.pad(g_row, ((0, G - 1), (0, 0)))
        bg_rows = jnp.pad(bg[:1], (0, G - 1))            # bg frozen to 0 in the module
    else:
        G = Cp
        wg_rows = jnp.pad(wg.reshape(Cout, K), ((0, Cp - Cout), (0, 0)))
        bg_rows = jnp.pad(bg, (0, Cp - Cout))
    w_cat = jnp.concatenate([wh_rows, wg_rows], axis=0).astype(compute_dtype)  # (Cp+G, K)
    b_cat = jnp.concatenate([bh_rows, bg_rows], axis=0).reshape(Cp + G, 1)     # f32

    # ---- im2col (transposed layout) + pixel-tile padding.
    patches, OH, OW = _im2col_t(x_nchw, KH, KW, stride, pad, dilation)
    M = B * OH * OW
    itemsize = jnp.dtype(compute_dtype).itemsize
    tm_eff = _pick_tm(M, K, Cp + G, Cp, tm, itemsize)
    Mpad = pl.cdiv(M, tm_eff) * tm_eff
    if Mpad != M:
        patches = jnp.pad(patches, ((0, 0), (0, Mpad - M)))
    patches = patches.astype(compute_dtype)

    kernel = _make_kernel(Cp, g_is_eye)
    out = pl.pallas_call(
        kernel,
        out_shape=jax.ShapeDtypeStruct((Cp, Mpad), jnp.float32),
        grid=(Mpad // tm_eff,),
        in_specs=[
            # Grid-invariant weight/bias slabs (tiny here; for very large Cin*KH*KW
            # consider pipeline_mode=pl.Buffered(1) so they are not double-buffered).
            pl.BlockSpec((Cp + G, K), lambda i: (0, 0)),
            pl.BlockSpec((Cp + G, 1), lambda i: (0, 0)),
            # Pixel tile of im2col patches: lane dim = tm (multiple of 128).
            pl.BlockSpec((K, tm_eff), lambda i: (0, i)),
        ],
        out_specs=pl.BlockSpec((Cp, tm_eff), lambda i: (0, i)),
        compiler_params=pltpu.CompilerParams(
            dimension_semantics=("parallel",),
            vmem_limit_bytes=_VMEM_LIMIT_BYTES),
    )(w_cat, b_cat, patches)

    # Slice off channel/pixel padding; (Cout, B*OH*OW) -> NCHW.
    out = out[:Cout, :M].reshape(Cout, B, OH, OW).transpose(1, 0, 2, 3)
    return out


def init_resconv2d_params(key, in_c, out_c, kernel, stride, pad, dilation=1):
    """Mirror ResConv2d.__init__: default conv_h init, eye-initialized frozen conv_g, BN defaults."""
    k1, k2 = jax.random.split(key)
    bound = (in_c * kernel * kernel) ** -0.5
    wh = jax.random.uniform(k1, (out_c, in_c, kernel, kernel), jnp.float32, -bound, bound)
    bh = jax.random.uniform(k2, (out_c,), jnp.float32, -bound, bound)
    # g conv: nn.init.eye_ on every (cout, cin) kernel slice, zero bias (frozen).
    wg = jnp.array(jnp.broadcast_to(jnp.eye(kernel, dtype=jnp.float32),
                                    (out_c, in_c, kernel, kernel)))
    bg = jnp.zeros((out_c,), jnp.float32)
    # BatchNorm2d defaults (eval mode): gamma=1, beta=0, running mean=0, var=1.
    return dict(wh=wh, bh=bh, wg=wg, bg=bg,
                gamma=jnp.ones((out_c,), jnp.float32),
                beta=jnp.zeros((out_c,), jnp.float32),
                running_mean=jnp.zeros((out_c,), jnp.float32),
                running_var=jnp.ones((out_c,), jnp.float32),
                stride=stride, pad=pad, dilation=dilation)


def resconv2d_reference(x, params, bn_eps=1e-5):
    """Pure-JAX reference (lax conv) for correctness checking."""
    stride, pad, dilation = params["stride"], params["pad"], params["dilation"]

    def conv(x, w, b):
        y = jax.lax.conv_general_dilated(
            x, w, window_strides=(stride, stride),
            padding=[(pad, pad), (pad, pad)],
            rhs_dilation=(dilation, dilation),
            dimension_numbers=("NCHW", "OIHW", "NCHW"))
        return y + b.reshape(1, -1, 1, 1)

    h = conv(x, params["wh"], params["bh"])
    sc = params["gamma"] / jnp.sqrt(params["running_var"] + bn_eps)
    sh = params["beta"] - params["running_mean"] * sc
    h = jnp.maximum(h * sc.reshape(1, -1, 1, 1) + sh.reshape(1, -1, 1, 1), 0.0)
    g = conv(x, params["wg"], params["bg"])
    return h + g


if __name__ == "__main__":
    # ResConv2d(in_c=4, out_c=8, kernel=3, stride=1, pad=1), input (B=2, 4, 16, 16)
    B, C, H, W = 2, 4, 16, 16
    out_c, kernel, stride, pad, dilation = 8, 3, 1, 1, 1

    key = jax.random.PRNGKey(0)
    key, xk, pk = jax.random.split(key, 3)
    x = jax.random.normal(xk, (B, C, H, W), jnp.float32)
    params = init_resconv2d_params(pk, C, out_c, kernel, stride, pad, dilation)

    ref = resconv2d_reference(x, params)

    # 1) Optimized path: bf16 inputs, eye-specialized residual branch (loosened tolerance).
    out = jax.block_until_ready(resconv2d_forward(x, params))
    assert out.shape == (B, out_c, H, W), out.shape
    assert jnp.allclose(out, ref, atol=5e-2, rtol=5e-2), \
        float(jnp.max(jnp.abs(out - ref)))

    # 2) f32 path (same kernel, full precision) — tight tolerance.
    out_f32 = jax.block_until_ready(
        resconv2d_forward(x, params, compute_dtype=jnp.float32))
    assert jnp.allclose(out_f32, ref, atol=1e-4, rtol=1e-4), \
        float(jnp.max(jnp.abs(out_f32 - ref)))

    # 3) General (non-eye-specialized) fallback path — tight tolerance.
    out_gen = jax.block_until_ready(
        resconv2d_forward(x, params, g_is_eye=False, compute_dtype=jnp.float32))
    assert jnp.allclose(out_gen, ref, atol=1e-4, rtol=1e-4), \
        float(jnp.max(jnp.abs(out_gen - ref)))

    print("KERNEL_OK")
</pallas_src>

<mosaic_0001>
module attributes {stable_mosaic.version = 11 : i64} {
  func.func @kernel(%arg0: i32, %arg1: memref<16x36xbf16, #tpu.memory_space<vmem>>, %arg2: memref<16x1xf32, #tpu.memory_space<vmem>>, %arg3: memref<36x256xbf16, #tpu.memory_space<vmem>>, %arg4: memref<8x256xf32, #tpu.memory_space<vmem>>) attributes {dimension_semantics = [#tpu.dimension_semantics<parallel>], iteration_bounds = array<i64: 2>, scalar_prefetch = 0 : i64, scratch_operands = 0 : i64, tpu.core_type = #tpu.core_type<tc>, window_params = [{pipeline_mode = #tpu.pipeline_mode<synchronous>, transform_indices = @transform_0, window_bounds = array<i64: 16, 36>}, {pipeline_mode = #tpu.pipeline_mode<synchronous>, transform_indices = @transform_1, window_bounds = array<i64: 16, 1>}, {transform_indices = @transform_2, window_bounds = array<i64: 36, 256>}, {transform_indices = @transform_3, window_bounds = array<i64: 8, 256>}]} {
    %c0 = arith.constant 0 : index
    %c0_0 = arith.constant 0 : index
    %0 = vector.load %arg1[%c0, %c0_0] : memref<16x36xbf16, #tpu.memory_space<vmem>>, vector<16x36xbf16>
    %c0_1 = arith.constant 0 : index
    %c0_2 = arith.constant 0 : index
    %1 = vector.load %arg3[%c0_1, %c0_2] : memref<36x256xbf16, #tpu.memory_space<vmem>>, vector<36x256xbf16>
    %cst = arith.constant dense<0.000000e+00> : vector<16x256xf32>
    %2 = tpu.matmul %0, %1, %cst {dimension_numbers = #tpu.dot_dimension_numbers<[1], [0], [0], [1], [0, 0, 1, 1], [], []>} : vector<16x36xbf16>, vector<36x256xbf16>, vector<16x256xf32> -> vector<16x256xf32>
    %c0_3 = arith.constant 0 : index
    %c0_4 = arith.constant 0 : index
    %3 = vector.load %arg2[%c0_3, %c0_4] : memref<16x1xf32, #tpu.memory_space<vmem>>, vector<16x1xf32>
    %4 = vector.broadcast %3 : vector<16x1xf32> to vector<16x256xf32>
    %5 = arith.addf %2, %4 : vector<16x256xf32>
    %6 = vector.extract_strided_slice %5 {offsets = [0, 0], sizes = [8, 256], strides = [1, 1]} : vector<16x256xf32> to vector<8x256xf32>
    %cst_5 = arith.constant 0.000000e+00 : f32
    %7 = vector.broadcast %cst_5 : f32 to vector<8x256xf32>
    %8 = arith.maximumf %6, %7 : vector<8x256xf32>
    %9 = vector.extract_strided_slice %5 {offsets = [8, 0], sizes = [1, 256], strides = [1, 1]} : vector<16x256xf32> to vector<1x256xf32>
    %10 = vector.broadcast %9 : vector<1x256xf32> to vector<8x256xf32>
    %11 = arith.addf %8, %10 : vector<8x256xf32>
    %c0_6 = arith.constant 0 : index
    %c0_7 = arith.constant 0 : index
    %12 = vector.load %arg4[%c0_6, %c0_7] : memref<8x256xf32, #tpu.memory_space<vmem>>, vector<8x256xf32>
    tpu.vector_store %arg4[%c0_6, %c0_7], %11 {strides = array<i32>} : memref<8x256xf32, #tpu.memory_space<vmem>>, vector<8x256xf32>,
    return
  }
  func.func @transform_0(%arg0: i32) -> (i32, i32) {
    %c0_i32 = arith.constant 0 : i32
    %c0_i32_0 = arith.constant 0 : i32
    %c0_i32_1 = arith.constant 0 : i32
    return %c0_i32, %c0_i32_0 : i32, i32
  }
  func.func @transform_1(%arg0: i32) -> (i32, i32) {
    %c0_i32 = arith.constant 0 : i32
    %c0_i32_0 = arith.constant 0 : i32
    %c0_i32_1 = arith.constant 0 : i32
    return %c0_i32, %c0_i32_0 : i32, i32
  }
  func.func @transform_2(%arg0: i32) -> (i32, i32) {
    %c0_i32 = arith.constant 0 : i32
    %c0_i32_0 = arith.constant 0 : i32
    return %c0_i32, %arg0 : i32, i32
  }
  func.func @transform_3(%arg0: i32) -> (i32, i32) {
    %c0_i32 = arith.constant 0 : i32
    %c0_i32_0 = arith.constant 0 : i32
    return %c0_i32, %arg0 : i32, i32
  }
}

</mosaic_0001>

<bundles_post_ra>
// kernel: tpu_custom_call.1
= control target key start
LH: loop header
LB: loop body
LE: loop exit
PB: predicated region body
PF: predicated region fallthrough
CT: control target
= control target key end

     0   :  { %8 = vsyncpa [#allocation3], 0  ;;  %s745_s0 = inlined_call_operand.vmem [shape: bf16[16,36], index: 0, kind: input, shape index: {}]   ;;  %s746_s1 = inlined_call_operand.vmem [shape: f32[16,1], index: 1, kind: input, shape index: {}]   ;;  %s747_s2 = inlined_call_operand.hbm [shape: bf16[36,512], index: 2, kind: input, shape index: {}]   ;;  %s748_s3 = inlined_call_operand.hbm [shape: f32[8,512], index: 3, kind: output, shape index: {}]  }
   0x1   :  { %10 = vsyncpa [#allocation3 + $0x1], 0 }
   0x2   :  { %11 = vsyncpa [#allocation4], 0 }
   0x3   :  { %13 = vsyncpa [#allocation4 + $0x1], 0  ;;  %s599_s12 = smov 0   ;;  %s601_s13 = smov 0  }
   0x4   :  { %s603_s14 = smov 0   ;;  %s605_s15 = smov 0  }
   0x5 LB: > { %s620_s16 = sadd.s32 4294967295, %s571_s15   ;;  %s394_s17 = sadd.s32 4294967294, %s571_s15   ;;  %s571_s15 = sphi %s605_s15, %s763_s15   ;;  %s567_s14 = sphi %s603_s14, %s762_s14   ;;  %s563_s13 = sphi %s601_s13, %s761_s13   ;;  %s559_s12 = sphi %s599_s12, %s760_s12  }
   0x6   : > { %s624_s18 = sadd.s32 1, %s571_s15   ;;  %s68_s19 = sadd.s32 1, %s567_s14 }
   0x7   : > { %s65_s20 = ssub.s32 %s571_s15, %s624_s18  ;;  %p75_p0 = scmp.ne.s32.totalorder %s567_s14, %s563_s13 }
   0x8   : > { %p66_p1 = scmp.eq.s32.totalorder %s65_s20, 0  ;;  %p76_p2 = scmp.eq.s32.totalorder %s571_s15, 0 }
   0x9   : > { %p81_p3 = scmp.ne.s32.totalorder %s563_s13, %s559_s12  ;;  %p82_p4 = scmp.eq.s32.totalorder %s620_s16, 0 }
   0xa   : > { %s636_s21 = scalar_select %p66_p1, %s567_s14, %s68_s19  }
   0xb   : > { %p77_p5 = por %p76_p2, %p75_p0  ;;  %p638_p6 = por %p82_p4, %p81_p3 }
   0xc   : > { %p105_p7 = scmp.eq.s32.totalorder %s620_s16, 1  ;;  %p111_p8 = scmp.eq.s32.totalorder %s394_s17, 1 }
   0xd   : > { %s751_s22 = scalar_select %p638_p6, 1, 0 }
   0xe   : > { %p431_p10 = scmp.lt.s32.totalorder %s571_s15, 2  ;;  %p645_p11 = por %p105_p7, %p75_p0 }
   0xf   : > { %p649_p12 = por %p111_p8, %p81_p3  ;;  %s137_s25 = sand.u32 1, %s567_s14  }
  0x10   : > { %s752_s23 = scalar_select %p645_p11, 1, 0 }
  0x11   : > { %s753_s24 = scalar_select %p649_p12, 1, 0 }
  0x12   : > { %s415_s26 = sshll.u32 %s571_s15, 7  ;;  %s417_s27 = smul.u32 40, %s137_s25 }
  0x13   : > { %s658_s30 = scalar_lea.hbm %s747_s2, %s415_s26  ;;  %p660_p13 = pnand %p431_p10, %p77_p5 }
  0x14   : > { %s141_s5 = scalar_lea.vmem [#allocation2], %s417_s27  ;;  %s667_s7 = scalar_lea.sflag [#allocation3], %s137_s25 }
  0x15   : > { %s148_s6 = sshll.u32 %s141_s5, 4  ;;  %s479_s8 = scalar_lea.hbm %s658_s30, 640  ;;  %s664_s6 = int_to_ptr.vmem [resolvable:$true] %s148_s6 }
  0x16   : > { %p480_p1 = scmp.ne.s32.totalorder %s658_s30, %s479_s8  ;;  %p481_p2 = pneg %p660_p13 }
  0x17   : > { %s484_s11 = scalar_lea.hbm %s747_s2, 1280  ;;  %p485_p5 = scmp.lt.s32.totalorder %s658_s30, %s747_s2 }
  0x18   : > { %p482_p3 = pnand %p481_p2, %p480_p1  ;;  %p486_p7 = scmp.lt.s32.totalorder %s484_s11, %s479_s8 }
  0x1a   : > { %p483_p4 = pneg %p482_p3  ;;  %p487_p8 = por %p486_p7, %p485_p5 }
  0x1c   : > { %p488_p10 = pnand %p487_p8, %p483_p4 }
  0x1e   : > { %491 = shalt.err (!%p488_p10)
}
  0x1f   : > { %s492_s20 = scalar_lea.vmem %s664_s6, 640  ;;  %s573_s25 = smov [#allocation2]  }
  0x20   : > { %p493_p9 = scmp.ne.s32.totalorder %s664_s6, %s492_s20  ;;  %s497_s26 = sshll.u32 %s573_s25, 4  ;;  %s498_s26 = int_to_ptr.vmem [resolvable:$false] %s497_s26 }
  0x21   : > { %s499_s27 = scalar_lea.vmem %s498_s26, 1280  ;;  %p500_p3 = scmp.lt.s32.totalorder %s664_s6, %s498_s26 }
  0x22   : > { %p495_p0 = pnand %p493_p9, %p481_p2  ;;  %p501_p12 = scmp.lt.s32.totalorder %s499_s27, %s492_s20 }
  0x24   : > { %p496_p1 = pneg %p495_p0  ;;  %p502_p11 = por %p501_p12, %p500_p3 }
  0x26   : > { %p503_p6 = pnand %p502_p11, %p496_p1 }
  0x28   : > { %506 = shalt.err (!%p503_p6)
}
  0x29   : > { %s574_s28 = smov 256   ;;  %s575_s29 = smov 128  }
  0x2a   : > { %s576_s5 = smov 8   ;;  %p156_p9 = scmp.lt.s32.totalorder %s571_s15, 3 }
  0x2b   : > { %426 = dma.hbm_to_vmem [thread:$0]  (!%p660_p13), %s658_s30, 640, %s664_s6, %s667_s7, %s574_s28, %s575_s29, %s576_s5  }
  0x2c   : > { %p755_p0 = scmp.ge.s32.totalorder %s571_s15, 1 }
  0x2e   : > { %p157_p2 = pnand %p755_p0, %p156_p9 }
  0x2f   : > { %s692_s8 = sand.u32 (!%p157_p2), 1, %s563_s13   ;;  %p756_p6 = scmp.ne.s32.totalorder (!%p157_p2), %s751_s22, 0 }
  0x30   : > { %160 = sbr.rel (%p157_p2) target bundleno = 287 (0x11f), region = 32  ;;  %s163_s10 = scalar_lea.sflag (!%p157_p2), [#allocation3], %s692_s8 }
  0x31   : > { %s418_s9 = smul.u32 (!%p157_p2), 40, %s692_s8 }
  0x33   : > { %s166_s11 = scalar_lea.vmem (!%p157_p2), [#allocation2], %s418_s9 }
  0x35   : > { %550 = dma.done.wait (%p756_p6), %s163_s10, 640  }
  0x36   : > { %552 = vsyncadd (%p756_p6), %s163_s10, 4294966656  ;;  %v577_v0 = vmov 0   ;;  %v198_v1 = vld [vmem:[%s166_s11 + $0x20] sm:$0x33]  ;;  %vm245_vm0 = vcmask 1041408   ;;  %vm241_vm1 = vcmask 293888   ;;  %v297_v12 = vlaneseq }
  0x37   : > { %284 = vmatprep.mubr.bf16.mxu0 %v577_v0  ;;  %469 = vset.pattern.permute.xlu0 %v577_v0  ;;  %v407_v2 = vcombine.high %v198_v1, %v198_v1  ;;  %v406_v3 = vcombine.low %v198_v1, %v198_v1  ;;  %v472_v4 = vld [vmem:[%s166_s11 + $0x14] ss:$8 sps:$4 sm:$0xff]   ;;  %v474_v6 = vld [vmem:[%s166_s11 + $0x10] ss:$8 sps:$4 sm:$0xff]   ;;  %v475_v8 = vld [vmem:[%s166_s11 + $0x4] ss:$8 sps:$4 sm:$0xff]  }
  0x38   : > { %v199_v7 = vld [vmem:[%s746_s1] sm:$0xff]  ;;  %v200_v9 = vld [vmem:[%s746_s1 + $0x8] sm:$0xff]  ;;  %v298_v14 = vshrl.u32 %v297_v12, 7  ;;  %s400_s19 = sshll.u32 %s692_s8, 4  ;;  %s416_s20 = sshll.u32 %s620_s16, 8 }
  0x39   : > { %408 = vmatprep.subr.msk.bf16.mxu0 %vm245_vm0, %v407_v2  ;;  %v247_v5 = vsel %vm245_vm0, %v406_v3, 0  ;;  %203 = vperm.xlu0 %469, %v199_v7   ;;  %v477_v10 = vld [vmem:[%s166_s11] ss:$8 sps:$4 sm:$0xff]   ;;  %s188_s25 = scalar_lea.vmem [#allocation5], %s400_s19  ;;  %s322_s29 = scalar_lea.hbm %s748_s3, %s416_s20 }
  0x3a   : > { %263 = vmatpush1.bf16.msra.mxu0 %v247_v5  ;;  %v478_v11 = vld [vmem:[%s745_s0] sm:$0xff]   ;;  %v299_v18 = vsub.s32 0, %v298_v14  ;;  %s324_s26 = sshll.u32 %s188_s25, 4  ;;  %s310_s5 = scalar_lea.sflag [#allocation4], %s692_s8  ;;  %s325_s26 = int_to_ptr.vmem [resolvable:$true] %s324_s26 }
  0x3b   : > { %264 = vmatprep.subr.bf16.mxu0 %v472_v4  ;;  %s507_s9 = scalar_lea.vmem %s325_s26, 256  ;;  %p757_p12 = scmp.ne.s32.totalorder %s752_s23, 0 }
  0x3c   : > { %p508_p11 = scmp.ne.s32.totalorder %s325_s26, %s507_s9  ;;  %s578_s16 = smov [#allocation5]  }
  0x3d   : > { %208 = vperm.xlu0 %469, %v200_v9   ;;  %s511_s10 = sshll.u32 %s578_s16, 4  ;;  %s512_s10 = int_to_ptr.vmem [resolvable:$false] %s511_s10 }
  0x3e   : > { %265 = vmatpush1.bf16.msra.mxu0 %v474_v6  ;;  %p509_p13 = pnand %p508_p11, %p757_p12  ;;  %s513_s11 = scalar_lea.vmem %s512_s10, 512 }
  0x3f   : > { %266 = vmatprep.subr.bf16.mxu0 %v475_v8  ;;  %p514_p5 = scmp.lt.s32.totalorder %s325_s26, %s512_s10  ;;  %p515_p7 = scmp.lt.s32.totalorder %s513_s11, %s507_s9 }
  0x40   : > { %p510_p4 = pneg %p509_p13 }
  0x41   : > { %p516_p8 = por %p515_p7, %p514_p5 }
  0x42   : > { %267 = vmatpush1.bf16.msra.mxu0 %v477_v10 }
  0x43   : > { %p517_p10 = pnand %p516_p8, %p510_p4 }
  0x45   : > { %409 = vmatmul.mubr.msk.bf16.vlgmr.msra.gmra.mxu0 %vm241_vm1, %v478_v11 }
  0xb4   : > { %v204_v13 = vpop.permute.xlu0 %203 }
  0xb8   : > { %v209_v19 = vpop.permute.xlu0 %208 }
 0x105   : > { %v286_v15 = vpop.f32.mrf.mxu0 }
 0x106   : > { %v287_v17 = vadd.f32 %v286_v15, %v204_v13 }
 0x107   : > { %v288_v16 = vpop.f32.mrf.mxu0 }
 0x108   : > { %v289_v21 = vadd.f32 %v288_v16, %v204_v13  ;;  %v295_v24 = vmax.f32 %v287_v17, 0.0 }
 0x109   : > { %v290_v20 = vpop.f32.mrf.mxu0 }
 0x10a   : > { %v291_v22 = vadd.f32 %v290_v20, %v209_v19  ;;  %v296_v27 = vmax.f32 %v289_v21, 0.0 }
 0x10b   : > { %v292_v23 = vpop.f32.mrf.mxu0 }
 0x10c   : > { %v300_v25 = vrot.slane %v291_v22, %v299_v18  ;;  %v293_v26 = vadd.f32 %v292_v23, %v209_v19 }
 0x10e   : > { %v305_v28 = vadd.f32 %v300_v25, %v295_v24  ;;  %v304_v29 = vrot.slane %v293_v26, %v299_v18 }
 0x110   : > { %v306_v30 = vadd.f32 %v304_v29, %v296_v27  ;;  %307 = vst [vmem:[%s188_s25] sm:$0xff] %v305_v28 }
 0x112   : > { %308 = vst [vmem:[%s188_s25 + $0x8] sm:$0xff] %v306_v30 }
 0x113   : > { %520 = shalt.err (!%p517_p10)
}
 0x114   : > { %s521_s30 = scalar_lea.hbm %s322_s29, 256  ;;  %s525_s22 = scalar_lea.hbm %s748_s3, 512 }
 0x115   : > { %p522_p1 = scmp.ne.s32.totalorder %s322_s29, %s521_s30  ;;  %p526_p0 = scmp.lt.s32.totalorder %s322_s29, %s748_s3 }
 0x116   : > { %p527_p2 = scmp.lt.s32.totalorder %s525_s22, %s521_s30 }
 0x117   : > { %p523_p3 = pnand %p522_p1, %p757_p12 }
 0x118   : > { %p528_p6 = por %p527_p2, %p526_p0 }
 0x119   : > { %p524_p9 = pneg %p523_p3 }
 0x11b   : > { %p529_p11 = pnand %p528_p6, %p524_p9 }
 0x11d   : > { %532 = shalt.err (!%p529_p11)
}
 0x11e   : > { %421 = dma.vmem_to_hbm [thread:$0]  (%p757_p12), %s325_s26, 256, %s322_s29, %s310_s5  }
 0x11f PF: > { %s336_s17 = sand.u32 1, %s559_s12   ;;  %p758_p13 = scmp.ne.s32.totalorder %s753_s24, 0 }
 0x120   : > { %p759_p4 = scmp.ge.s32.totalorder %s571_s15, 2  ;;  %s337_s19 = scalar_lea.sflag [#allocation4], %s336_s17 }
 0x122   : > { %p428_p5 = pnand %p759_p4, %p758_p13 }
 0x124   : > { %p429_p7 = pneg %p428_p5 }
 0x126   : > { %554 = dma.done.wait (%p429_p7), %s337_s19, 256  }
 0x127   : > { %556 = vsyncadd (%p429_p7), %s337_s19, 4294967040  ;;  %p16_p8 = scmp.ge.s32.totalorder %s624_s18, 4   ;;  %s760_s12 = smov %s563_s13 }
 0x128   : > { %s761_s13 = smov %s567_s14  ;;  %s762_s14 = smov %s636_s21 }
 0x129   : > { %s763_s15 = smov %s624_s18  ;;  %18 = sbr.rel (!%p16_p8) target bundleno = 5 (0x5), region = 77 }
 0x12e   :  { %342 = vsyncpa [#allocation3], 1 }
 0x12f   :  { %344 = vsyncpa [#allocation3 + $0x1], 1 }
 0x130   :  { %345 = vsyncpa [#allocation4], 1 }
 0x131   :  { %347 = vsyncpa [#allocation4 + $0x1], 1 }

</bundles_post_ra>
